<compile_context>
chip_gen: v7x
topology: tpu7x:2x2x1
jax: 0.10.0
libtpu: 0.0.40
codegen_flags: <defaults>
</compile_context>

<pallas_src>
import jax
import jax.numpy as jnp
from jax.experimental import pallas as pl
from jax.experimental.pallas import tpu as pltpu


def _round_up(n, m):
    return ((n + m - 1) // m) * m


def _nbytes(a):
    return a.size * a.dtype.itemsize


def gru_seq_kernel(x_ref, h0_ref, w_i3_ref, w_h2_ref, w_hh_ref, b3_ref,
                   o_ref, h_scr):
    """One (batch-tile, time-step) grid point.

    x_ref  : (1, Bt, I)  input dtype (cast to bf16 at the matmul boundary)
    h0_ref : (Bt, H)     initial hidden state for this batch tile
    w_i3   : (I, 3H) bf16  [W_ir | W_iz | W_ih]
    w_h2   : (H, 2H) bf16  [W_hr | W_hz]
    w_hh   : (H, H)  bf16
    b3     : (1, 3H) f32   [b_ir+b_hr | b_iz+b_hz | b_ih+b_hh]
    o_ref  : (1, Bt, H)  hidden state emitted at this time step
    h_scr  : (Bt, H) f32 VMEM-carried hidden state across the T grid axis
    """
    t = pl.program_id(1)
    H = h_scr.shape[-1]

    @pl.when(t == 0)
    def _():
        h_scr[...] = h0_ref[...].astype(jnp.float32)

    h = h_scr[...]                                   # f32 carried state
    x = x_ref[0].astype(jnp.bfloat16)                # cast at matmul boundary
    h_bf = h.astype(jnp.bfloat16)

    # Fused input projection for all three gates (+ pre-summed biases), f32 acc.
    xg = jnp.dot(x, w_i3_ref[...], preferred_element_type=jnp.float32) + b3_ref[...]
    # Fused hidden projection for the r and z gates.
    hg = jnp.dot(h_bf, w_h2_ref[...], preferred_element_type=jnp.float32)

    r = jax.nn.sigmoid(xg[:, :H] + hg[:, :H])
    z = jax.nn.sigmoid(xg[:, H:2 * H] + hg[:, H:2 * H])

    hr = (h * r).astype(jnp.bfloat16)                # cast only at matmul boundary
    g = jnp.tanh(xg[:, 2 * H:] +
                 jnp.dot(hr, w_hh_ref[...], preferred_element_type=jnp.float32))

    h_next = z * h + (1.0 - z) * g                   # f32 blend (v5e-safe)

    h_scr[...] = h_next
    o_ref[0] = h_next.astype(o_ref.dtype)


def pack_gru_params(params):
    """Fuse per-gate f32 params into packed bf16 weights + one f32 bias row.

    Weights are stored (fan_in, fan_out) == PyTorch weight.T so x @ W matches
    nn.Linear.  No column padding: full-array blocks are always legal, and for
    H % 128 == 0 the packed layout is already lane-dense.
    """
    w_i3 = jnp.concatenate(
        [params["w_ir"], params["w_iz"], params["w_ih"]], axis=1).astype(jnp.bfloat16)
    w_h2 = jnp.concatenate(
        [params["w_hr"], params["w_hz"]], axis=1).astype(jnp.bfloat16)
    w_hh = params["w_hh"].astype(jnp.bfloat16)
    b3 = jnp.concatenate(
        [params["b_ir"] + params["b_hr"],
         params["b_iz"] + params["b_hz"],
         params["b_ih"] + params["b_hh"]], axis=1).astype(jnp.float32)
    return w_i3, w_h2, w_hh, b3


def gru_sequence_forward(xs, h0, packed, *, out_dtype=jnp.float32, block_b=None):
    """Run T fused GRU steps in one pallas_call.

    xs: (T, B, input_size), h0: (B, hidden_size) -> (T, B, hidden_size).
    Weights stay resident (single-buffered) in VMEM for the whole grid.
    """
    T, B, I = xs.shape
    H = h0.shape[-1]
    w_i3, w_h2, w_hh, b3 = packed

    if block_b is None:
        # One tile for the common case (fewest grid steps on single-TC v5e/v6e,
        # no batch padding); split only when B is large enough to be MXU-bound
        # so v7x's second TensorCore earns its extra weight DMA.
        block_b = B if B <= 512 else 256

    if B % block_b != 0:
        B_pad = _round_up(B, block_b)        # rare path; pad rows are wasted work only
        xs = jnp.pad(xs, ((0, 0), (0, B_pad - B), (0, 0)))
        h0 = jnp.pad(h0, ((0, B_pad - B), (0, 0)))
    else:
        B_pad = B
    nb = B_pad // block_b

    out_itemsize = jax.ShapeDtypeStruct((), out_dtype).dtype.itemsize
    weight_bytes = _nbytes(w_i3) + _nbytes(w_h2) + _nbytes(w_hh) + _nbytes(b3)

    # Advisory cost for XLA scheduling around the custom call.
    cost = pl.CostEstimate(
        flops=2 * T * B_pad * 3 * H * (I + H),
        transcendentals=3 * T * B_pad * H,
        bytes_accessed=(weight_bytes + _nbytes(xs) + _nbytes(h0)
                        + T * B_pad * H * out_itemsize))

    # VMEM budget: single-buffered resident weights + double-buffered x/h0/out
    # tiles + carried-h scratch + headroom for gate intermediates.
    tile_bytes = 2 * block_b * (I * xs.dtype.itemsize + H * 4 + H * out_itemsize)
    scratch_bytes = block_b * H * 4
    headroom = 10 * block_b * H * 4 + (1 << 20)
    vmem_limit = int(min(64 * 2**20,
                         max(32 * 2**20,
                             weight_bytes + tile_bytes + scratch_bytes + headroom)))

    const2 = lambda b, t: (0, 0)
    out = pl.pallas_call(
        gru_seq_kernel,
        out_shape=jax.ShapeDtypeStruct((T, B_pad, H), out_dtype),
        grid=(nb, T),
        in_specs=[
            pl.BlockSpec((1, block_b, I), lambda b, t: (t, b, 0)),   # x_t tile
            pl.BlockSpec((block_b, H), lambda b, t: (b, 0)),         # h0 tile
            # Resident, single-buffered weights / bias (constant block index).
            pl.BlockSpec(w_i3.shape, const2, pipeline_mode=pl.Buffered(1)),
            pl.BlockSpec(w_h2.shape, const2, pipeline_mode=pl.Buffered(1)),
            pl.BlockSpec(w_hh.shape, const2, pipeline_mode=pl.Buffered(1)),
            pl.BlockSpec(b3.shape, const2, pipeline_mode=pl.Buffered(1)),
        ],
        out_specs=pl.BlockSpec((1, block_b, H), lambda b, t: (t, b, 0)),
        scratch_shapes=[pltpu.VMEM((block_b, H), jnp.float32)],      # carried h
        compiler_params=pltpu.CompilerParams(
            dimension_semantics=("parallel", "arbitrary"),
            vmem_limit_bytes=vmem_limit),
        cost_estimate=cost,
    )(xs, h0, w_i3, w_h2, w_hh, b3)

    return out if B_pad == B else out[:, :B]


def gru_cell_forward(x, hidden, packed, *, out_dtype=jnp.float32, block_b=None):
    """Single GRU step (the PyTorch module's forward): (B,I),(B,H) -> (B,H)."""
    return gru_sequence_forward(x[None], hidden, packed,
                                out_dtype=out_dtype, block_b=block_b)[0]


def _xavier_normal(key, fan_in, fan_out):
    std = (2.0 / (fan_in + fan_out)) ** 0.5
    # Stored as (fan_in, fan_out) == PyTorch weight.T, so x @ W matches x @ weight.T
    return std * jax.random.normal(key, (fan_in, fan_out), dtype=jnp.float32)


def _linear_bias(key, fan_in, fan_out):
    # PyTorch nn.Linear default bias init: U(-1/sqrt(fan_in), 1/sqrt(fan_in))
    bound = 1.0 / (fan_in ** 0.5)
    return jax.random.uniform(key, (1, fan_out), dtype=jnp.float32,
                              minval=-bound, maxval=bound)


def init_gru_params(key, input_size, hidden_size):
    keys = jax.random.split(key, 12)
    names = [("w_ir", "b_ir", input_size), ("w_hr", "b_hr", hidden_size),
             ("w_iz", "b_iz", input_size), ("w_hz", "b_hz", hidden_size),
             ("w_ih", "b_ih", input_size), ("w_hh", "b_hh", hidden_size)]
    p = {}
    for i, (wname, bname, fan_in) in enumerate(names):
        p[wname] = _xavier_normal(keys[2 * i], fan_in, hidden_size)
        p[bname] = _linear_bias(keys[2 * i + 1], fan_in, hidden_size)
    return p


if __name__ == "__main__":
    key = jax.random.PRNGKey(0)
    k_x, k_h, k_p, k_seq = jax.random.split(key, 4)

    batch, input_size, hidden_size, seq_len = 8, 32, 32, 6

    x = jax.random.normal(k_x, (batch, input_size), dtype=jnp.float32)
    hidden = jax.random.normal(k_h, (batch, hidden_size), dtype=jnp.float32)
    params = init_gru_params(k_p, input_size, hidden_size)
    packed = pack_gru_params(params)

    # Pure-JAX references. bf16 ref matches the kernel's matmul boundaries.
    def step_bf16(x, h, p):
        bf = jnp.bfloat16

        def mm(a, w):
            return jnp.dot(a.astype(bf), w.astype(bf),
                           preferred_element_type=jnp.float32)

        r = jax.nn.sigmoid(mm(x, p["w_ir"]) + p["b_ir"] + mm(h, p["w_hr"]) + p["b_hr"])
        z = jax.nn.sigmoid(mm(x, p["w_iz"]) + p["b_iz"] + mm(h, p["w_hz"]) + p["b_hz"])
        g = jnp.tanh(mm(x, p["w_ih"]) + p["b_ih"] + mm(h * r, p["w_hh"]) + p["b_hh"])
        return z * h + (1.0 - z) * g

    def step_f32(x, h, p):
        r = jax.nn.sigmoid(x @ p["w_ir"] + p["b_ir"] + h @ p["w_hr"] + p["b_hr"])
        z = jax.nn.sigmoid(x @ p["w_iz"] + p["b_iz"] + h @ p["w_hz"] + p["b_hz"])
        g = jnp.tanh(x @ p["w_ih"] + p["b_ih"] + (h * r) @ p["w_hh"] + p["b_hh"])
        return z * h + (1.0 - z) * g

    # --- single GRU step: the PyTorch module's forward ---
    h_next = gru_cell_forward(x, hidden, packed)
    jax.block_until_ready(h_next)
    assert h_next.shape == (batch, hidden_size)
    assert jnp.allclose(h_next, step_bf16(x, hidden, params), atol=2e-3, rtol=2e-3)
    assert jnp.allclose(h_next, step_f32(x, hidden, params), atol=5e-2, rtol=5e-2)

    # --- fused T-step sequence: time loop inside one pallas_call ---
    xs = jax.random.normal(k_seq, (seq_len, batch, input_size), dtype=jnp.float32)
    hs = gru_sequence_forward(xs, hidden, packed)
    jax.block_until_ready(hs)
    assert hs.shape == (seq_len, batch, hidden_size)

    h_ref = hidden
    hs_ref = []
    for t in range(seq_len):
        h_ref = step_bf16(xs[t], h_ref, params)
        hs_ref.append(h_ref)
    hs_ref = jnp.stack(hs_ref)
    assert jnp.allclose(hs, hs_ref, atol=2e-2, rtol=2e-2)

    print("KERNEL_OK")
</pallas_src>

<mosaic_0001>
module attributes {stable_mosaic.version = 11 : i64} {
  func.func @gru_seq_kernel(%arg0: i32, %arg1: i32, %arg2: memref<1x8x32xf32, #tpu.memory_space<vmem>>, %arg3: memref<8x32xf32, #tpu.memory_space<vmem>>, %arg4: memref<32x96xbf16, #tpu.memory_space<vmem>>, %arg5: memref<32x64xbf16, #tpu.memory_space<vmem>>, %arg6: memref<32x32xbf16, #tpu.memory_space<vmem>>, %arg7: memref<1x96xf32, #tpu.memory_space<vmem>>, %arg8: memref<1x8x32xf32, #tpu.memory_space<vmem>>, %arg9: memref<8x32xf32, #tpu.memory_space<vmem>>) attributes {dimension_semantics = [#tpu.dimension_semantics<parallel>, #tpu.dimension_semantics<arbitrary>], iteration_bounds = array<i64: 1, 1>, scalar_prefetch = 0 : i64, scratch_operands = 1 : i64, tpu.core_type = #tpu.core_type<tc>, window_params = [{transform_indices = @transform_0, window_bounds = array<i64: 1, 8, 32>}, {transform_indices = @transform_1, window_bounds = array<i64: 8, 32>}, {pipeline_mode = #tpu.pipeline_mode<synchronous>, transform_indices = @transform_2, window_bounds = array<i64: 32, 96>}, {pipeline_mode = #tpu.pipeline_mode<synchronous>, transform_indices = @transform_3, window_bounds = array<i64: 32, 64>}, {pipeline_mode = #tpu.pipeline_mode<synchronous>, transform_indices = @transform_4, window_bounds = array<i64: 32, 32>}, {pipeline_mode = #tpu.pipeline_mode<synchronous>, transform_indices = @transform_5, window_bounds = array<i64: 1, 96>}, {transform_indices = @transform_6, window_bounds = array<i64: 1, 8, 32>}]} {
    %c0_i32 = arith.constant 0 : i32
    %0 = arith.cmpi eq, %arg1, %c0_i32 : i32
    %1 = arith.extui %0 : i1 to i32
    %c0_i32_0 = arith.constant 0 : i32
    %2 = arith.cmpi ne, %1, %c0_i32_0 : i32
    scf.if %2 {
      %c0_23 = arith.constant 0 : index
      %c0_24 = arith.constant 0 : index
      %47 = vector.load %arg3[%c0_23, %c0_24] : memref<8x32xf32, #tpu.memory_space<vmem>>, vector<8x32xf32>
      %c0_25 = arith.constant 0 : index
      %c0_26 = arith.constant 0 : index
      %48 = vector.load %arg9[%c0_25, %c0_26] : memref<8x32xf32, #tpu.memory_space<vmem>>, vector<8x32xf32>
      tpu.vector_store %arg9[%c0_25, %c0_26], %47 {strides = array<i32>} : memref<8x32xf32, #tpu.memory_space<vmem>>, vector<8x32xf32>,
    } else {
    }
    %c0 = arith.constant 0 : index
    %c0_1 = arith.constant 0 : index
    %3 = vector.load %arg9[%c0, %c0_1] : memref<8x32xf32, #tpu.memory_space<vmem>>, vector<8x32xf32>
    %c0_2 = arith.constant 0 : index
    %c0_3 = arith.constant 0 : index
    %c0_4 = arith.constant 0 : index
    %4 = vector.load %arg2[%c0_2, %c0_3, %c0_4] : memref<1x8x32xf32, #tpu.memory_space<vmem>>, vector<1x8x32xf32>
    %5 = vector.shape_cast %4 : vector<1x8x32xf32> to vector<8x32xf32>
    %6 = arith.truncf %5 : vector<8x32xf32> to vector<8x32xbf16>
    %7 = arith.truncf %3 : vector<8x32xf32> to vector<8x32xbf16>
    %c0_5 = arith.constant 0 : index
    %c0_6 = arith.constant 0 : index
    %8 = vector.load %arg4[%c0_5, %c0_6] : memref<32x96xbf16, #tpu.memory_space<vmem>>, vector<32x96xbf16>
    %cst = arith.constant dense<0.000000e+00> : vector<8x96xf32>
    %9 = tpu.matmul %6, %8, %cst {dimension_numbers = #tpu.dot_dimension_numbers<[1], [0], [0], [1], [0, 0, 1, 1], [], []>} : vector<8x32xbf16>, vector<32x96xbf16>, vector<8x96xf32> -> vector<8x96xf32>
    %c0_7 = arith.constant 0 : index
    %c0_8 = arith.constant 0 : index
    %10 = vector.load %arg7[%c0_7, %c0_8] : memref<1x96xf32, #tpu.memory_space<vmem>>, vector<1x96xf32>
    %11 = vector.broadcast %10 : vector<1x96xf32> to vector<8x96xf32>
    %12 = arith.addf %9, %11 : vector<8x96xf32>
    %c0_9 = arith.constant 0 : index
    %c0_10 = arith.constant 0 : index
    %13 = vector.load %arg5[%c0_9, %c0_10] : memref<32x64xbf16, #tpu.memory_space<vmem>>, vector<32x64xbf16>
    %cst_11 = arith.constant dense<0.000000e+00> : vector<8x64xf32>
    %14 = tpu.matmul %7, %13, %cst_11 {dimension_numbers = #tpu.dot_dimension_numbers<[1], [0], [0], [1], [0, 0, 1, 1], [], []>} : vector<8x32xbf16>, vector<32x64xbf16>, vector<8x64xf32> -> vector<8x64xf32>
    %15 = vector.extract_strided_slice %12 {offsets = [0, 0], sizes = [8, 32], strides = [1, 1]} : vector<8x96xf32> to vector<8x32xf32>
    %16 = vector.extract_strided_slice %14 {offsets = [0, 0], sizes = [8, 32], strides = [1, 1]} : vector<8x64xf32> to vector<8x32xf32>
    %17 = arith.addf %15, %16 : vector<8x32xf32>
    %18 = arith.negf %17 : vector<8x32xf32>
    %19 = math.exp %18 : vector<8x32xf32>
    %cst_12 = arith.constant 1.000000e+00 : f32
    %20 = vector.broadcast %cst_12 : f32 to vector<8x32xf32>
    %21 = arith.addf %20, %19 : vector<8x32xf32>
    %22 = arith.divf %20, %21 : vector<8x32xf32>
    %23 = vector.extract_strided_slice %12 {offsets = [0, 32], sizes = [8, 32], strides = [1, 1]} : vector<8x96xf32> to vector<8x32xf32>
    %24 = vector.extract_strided_slice %14 {offsets = [0, 32], sizes = [8, 32], strides = [1, 1]} : vector<8x64xf32> to vector<8x32xf32>
    %25 = arith.addf %23, %24 : vector<8x32xf32>
    %26 = arith.negf %25 : vector<8x32xf32>
    %27 = math.exp %26 : vector<8x32xf32>
    %cst_13 = arith.constant 1.000000e+00 : f32
    %28 = vector.broadcast %cst_13 : f32 to vector<8x32xf32>
    %29 = arith.addf %28, %27 : vector<8x32xf32>
    %30 = arith.divf %28, %29 : vector<8x32xf32>
    %31 = arith.mulf %3, %22 : vector<8x32xf32>
    %32 = arith.truncf %31 : vector<8x32xf32> to vector<8x32xbf16>
    %33 = vector.extract_strided_slice %12 {offsets = [0, 64], sizes = [8, 32], strides = [1, 1]} : vector<8x96xf32> to vector<8x32xf32>
    %c0_14 = arith.constant 0 : index
    %c0_15 = arith.constant 0 : index
    %34 = vector.load %arg6[%c0_14, %c0_15] : memref<32x32xbf16, #tpu.memory_space<vmem>>, vector<32x32xbf16>
    %cst_16 = arith.constant dense<0.000000e+00> : vector<8x32xf32>
    %35 = tpu.matmul %32, %34, %cst_16 {dimension_numbers = #tpu.dot_dimension_numbers<[1], [0], [0], [1], [0, 0, 1, 1], [], []>} : vector<8x32xbf16>, vector<32x32xbf16>, vector<8x32xf32> -> vector<8x32xf32>
    %36 = arith.addf %33, %35 : vector<8x32xf32>
    %37 = math.tanh %36 : vector<8x32xf32>
    %38 = arith.mulf %30, %3 : vector<8x32xf32>
    %cst_17 = arith.constant 1.000000e+00 : f32
    %39 = vector.broadcast %cst_17 : f32 to vector<8x32xf32>
    %40 = arith.subf %39, %30 : vector<8x32xf32>
    %41 = arith.mulf %40, %37 : vector<8x32xf32>
    %42 = arith.addf %38, %41 : vector<8x32xf32>
    %c0_18 = arith.constant 0 : index
    %c0_19 = arith.constant 0 : index
    %43 = vector.load %arg9[%c0_18, %c0_19] : memref<8x32xf32, #tpu.memory_space<vmem>>, vector<8x32xf32>
    tpu.vector_store %arg9[%c0_18, %c0_19], %42 {strides = array<i32>} : memref<8x32xf32, #tpu.memory_space<vmem>>, vector<8x32xf32>,
    %c0_20 = arith.constant 0 : index
    %c0_21 = arith.constant 0 : index
    %c0_22 = arith.constant 0 : index
    %44 = vector.load %arg8[%c0_20, %c0_21, %c0_22] : memref<1x8x32xf32, #tpu.memory_space<vmem>>, vector<1x8x32xf32>
    %45 = vector.shape_cast %44 : vector<1x8x32xf32> to vector<8x32xf32>
    %46 = vector.shape_cast %42 : vector<8x32xf32> to vector<1x8x32xf32>
    tpu.vector_store %arg8[%c0_20, %c0_21, %c0_22], %46 {strides = array<i32>} : memref<1x8x32xf32, #tpu.memory_space<vmem>>, vector<1x8x32xf32>,
    return
  }
  func.func @transform_0(%arg0: i32, %arg1: i32) -> (i32, i32, i32) {
    %c0_i32 = arith.constant 0 : i32
    %c0_i32_0 = arith.constant 0 : i32
    return %arg1, %arg0, %c0_i32 : i32, i32, i32
  }
  func.func @transform_1(%arg0: i32, %arg1: i32) -> (i32, i32) {
    %c0_i32 = arith.constant 0 : i32
    %c0_i32_0 = arith.constant 0 : i32
    return %arg0, %c0_i32 : i32, i32
  }
  func.func @transform_2(%arg0: i32, %arg1: i32) -> (i32, i32) {
    %c0_i32 = arith.constant 0 : i32
    %c0_i32_0 = arith.constant 0 : i32
    %c0_i32_1 = arith.constant 0 : i32
    return %c0_i32, %c0_i32_0 : i32, i32
  }
  func.func @transform_3(%arg0: i32, %arg1: i32) -> (i32, i32) {
    %c0_i32 = arith.constant 0 : i32
    %c0_i32_0 = arith.constant 0 : i32
    %c0_i32_1 = arith.constant 0 : i32
    return %c0_i32, %c0_i32_0 : i32, i32
  }
  func.func @transform_4(%arg0: i32, %arg1: i32) -> (i32, i32) {
    %c0_i32 = arith.constant 0 : i32
    %c0_i32_0 = arith.constant 0 : i32
    %c0_i32_1 = arith.constant 0 : i32
    return %c0_i32, %c0_i32_0 : i32, i32
  }
  func.func @transform_5(%arg0: i32, %arg1: i32) -> (i32, i32) {
    %c0_i32 = arith.constant 0 : i32
    %c0_i32_0 = arith.constant 0 : i32
    %c0_i32_1 = arith.constant 0 : i32
    return %c0_i32, %c0_i32_0 : i32, i32
  }
  func.func @transform_6(%arg0: i32, %arg1: i32) -> (i32, i32, i32) {
    %c0_i32 = arith.constant 0 : i32
    %c0_i32_0 = arith.constant 0 : i32
    return %arg1, %arg0, %c0_i32 : i32, i32, i32
  }
}

</mosaic_0001>

<bundles_post_ra>
// kernel: tpu_custom_call.1
= control target key start
LH: loop header
LB: loop body
LE: loop exit
PB: predicated region body
PF: predicated region fallthrough
CT: control target
= control target key end

     0   :  { %11 = vsyncpa [#allocation4], 0  ;;  %s684_s0 = inlined_call_operand.hbm [shape: f32[1,8,32], index: 0, kind: input, shape index: {}]   ;;  %s685_s1 = inlined_call_operand.hbm [shape: f32[8,32], index: 1, kind: input, shape index: {}]   ;;  %s686_s2 = inlined_call_operand.hbm [shape: bf16[32,96], index: 2, kind: input, shape index: {}]   ;;  %s687_s3 = inlined_call_operand.hbm [shape: bf16[32,64], index: 3, kind: input, shape index: {}]   ;;  %s688_s4 = inlined_call_operand.hbm [shape: bf16[32,32], index: 4, kind: input, shape index: {}]   ;;  %s689_s5 = inlined_call_operand.vmem [shape: f32[1,96], index: 5, kind: input, shape index: {}]   ;;  %s690_s6 = inlined_call_operand.hbm [shape: f32[1,8,32], index: 6, kind: output, shape index: {}]  }
   0x1   :  { %12 = vsyncpa [#allocation7], 0 }
   0x2   :  { %13 = vsyncpa [#allocation10], 0 }
   0x3   :  { %14 = vsyncpa [#allocation5], 0  ;;  %s543_s21 = smov [#allocation6]   ;;  %s403_s25 = scalar_lea.hbm %s685_s1, 128 }
   0x4   :  { %s31_s22 = sshll.u32 %s543_s21, 4  ;;  %p404_p0 = scmp.ne.s32.totalorder %s685_s1, %s403_s25  ;;  %s32_s22 = int_to_ptr.vmem [resolvable:$true] %s31_s22 }
   0x5   :  { %p407_p1 = scmp.lt.u32.totalorder %s403_s25, %s685_s1 }
   0x7   :  { %p409_p2 = pnand %p407_p1, %p404_p0 }
   0x9   :  { %412 = shalt.err (!%p409_p2)
}
   0xa   :  { %s413_s30 = scalar_lea.vmem %s32_s22, 128  ;;  %p418_p4 = scmp.lt.s32.totalorder %s32_s22, %s32_s22 }
   0xb   :  { %p414_p3 = scmp.ne.s32.totalorder %s32_s22, %s413_s30  ;;  %p419_p5 = scmp.lt.s32.totalorder %s413_s30, %s413_s30 }
   0xd   :  { %p420_p6 = por %p419_p5, %p418_p4 }
   0xf   :  { %p421_p7 = pnand %p420_p6, %p414_p3 }
  0x11   :  { %424 = shalt.err (!%p421_p7)
}
  0x12   :  { %34 = dma.hbm_to_vmem [thread:$0]  %s685_s1, 128, %s32_s22, [#allocation7]  }
  0x13   :  { %s544_s9 = smov [#allocation9]   ;;  %s545_s11 = smov [#allocation3]  }
  0x14   :  { %s52_s10 = sshll.u32 %s544_s9, 4  ;;  %s21_s12 = sshll.u32 %s545_s11, 4  ;;  %s53_s10 = int_to_ptr.vmem [resolvable:$true] %s52_s10  ;;  %s22_s12 = int_to_ptr.vmem [resolvable:$true] %s21_s12 }
  0x15   :  { %s425_s15 = scalar_lea.hbm %s687_s3, 256 }
  0x16   :  { %p426_p8 = scmp.ne.s32.totalorder %s687_s3, %s425_s15  ;;  %p429_p9 = scmp.lt.u32.totalorder %s425_s15, %s687_s3 }
  0x18   :  { %p431_p10 = pnand %p429_p9, %p426_p8 }
  0x1a   :  { %434 = shalt.err (!%p431_p10)
}
  0x1b   :  { %s435_s1 = scalar_lea.vmem %s53_s10, 256  ;;  %p440_p12 = scmp.lt.s32.totalorder %s53_s10, %s53_s10 }
  0x1c   :  { %p436_p11 = scmp.ne.s32.totalorder %s53_s10, %s435_s1  ;;  %p441_p13 = scmp.lt.s32.totalorder %s435_s1, %s435_s1 }
  0x1e   :  { %p442_p0 = por %p441_p13, %p440_p12 }
  0x20   :  { %p443_p1 = pnand %p442_p0, %p436_p11 }
  0x22   :  { %446 = shalt.err (!%p443_p1)
}
  0x23   :  { %s546_s20 = smov 64   ;;  %s547_s21 = smov 4  }
  0x24   :  { %58 = dma.hbm_to_vmem [thread:$0]  %s687_s3, 256, %s53_s10, [#allocation10], %s546_s20, %s546_s20, %s547_s21  }
  0x25   :  { %s447_s26 = scalar_lea.hbm %s684_s0, 128 }
  0x26   :  { %p448_p2 = scmp.ne.s32.totalorder %s684_s0, %s447_s26  ;;  %p451_p3 = scmp.lt.u32.totalorder %s447_s26, %s684_s0 }
  0x28   :  { %p453_p4 = pnand %p451_p3, %p448_p2 }
  0x2a   :  { %456 = shalt.err (!%p453_p4)
}
  0x2b   :  { %s457_s7 = scalar_lea.vmem %s22_s12, 128  ;;  %p462_p6 = scmp.lt.s32.totalorder %s22_s12, %s22_s12 }
  0x2c   :  { %p458_p5 = scmp.ne.s32.totalorder %s22_s12, %s457_s7  ;;  %p463_p7 = scmp.lt.s32.totalorder %s457_s7, %s457_s7 }
  0x2e   :  { %p464_p8 = por %p463_p7, %p462_p6 }
  0x30   :  { %p465_p9 = pnand %p464_p8, %p458_p5 }
  0x32   :  { %468 = shalt.err (!%p465_p9)
}
  0x33   :  { %24 = dma.hbm_to_vmem [thread:$0]  %s684_s0, 128, %s22_s12, [#allocation4]  }
  0x34   :  { %s548_s9 = smov [#allocation8]   ;;  %s549_s11 = smov [#allocation11]  }
  0x35   :  { %s40_s10 = sshll.u32 %s548_s9, 4  ;;  %s64_s13 = sshll.u32 %s549_s11, 4  ;;  %s41_s10 = int_to_ptr.vmem [resolvable:$true] %s40_s10  ;;  %s65_s13 = int_to_ptr.vmem [resolvable:$true] %s64_s13 }
  0x36   :  { %s469_s16 = scalar_lea.hbm %s686_s2, 256 }
  0x37   :  { %p470_p10 = scmp.ne.s32.totalorder %s686_s2, %s469_s16  ;;  %p473_p11 = scmp.lt.u32.totalorder %s469_s16, %s686_s2 }
  0x39   :  { %p475_p12 = pnand %p473_p11, %p470_p10 }
  0x3b   :  { %478 = shalt.err (!%p475_p12)
}
  0x3c   :  { %s479_s0 = scalar_lea.vmem %s41_s10, 256  ;;  %p484_p0 = scmp.lt.s32.totalorder %s41_s10, %s41_s10 }
  0x3d   :  { %p480_p13 = scmp.ne.s32.totalorder %s41_s10, %s479_s0  ;;  %p485_p1 = scmp.lt.s32.totalorder %s479_s0, %s479_s0 }
  0x3f   :  { %p486_p2 = por %p485_p1, %p484_p0 }
  0x41   :  { %p487_p3 = pnand %p486_p2, %p480_p13 }
  0x43   :  { %490 = shalt.err (!%p487_p3)
}
  0x44   :  { %46 = dma.hbm_to_vmem [thread:$0]  %s686_s2, 256, %s41_s10, [#allocation7], %s546_s20, %s546_s20, %s547_s21  }
  0x45   :  { %s491_s25 = scalar_lea.hbm %s688_s4, 256 }
  0x46   :  { %p492_p4 = scmp.ne.s32.totalorder %s688_s4, %s491_s25  ;;  %p495_p5 = scmp.lt.u32.totalorder %s491_s25, %s688_s4 }
  0x48   :  { %p497_p6 = pnand %p495_p5, %p492_p4 }
  0x4a   :  { %500 = shalt.err (!%p497_p6)
}
  0x4b   :  { %s501_s30 = scalar_lea.vmem %s65_s13, 256  ;;  %p506_p8 = scmp.lt.s32.totalorder %s65_s13, %s65_s13 }
  0x4c   :  { %p502_p7 = scmp.ne.s32.totalorder %s65_s13, %s501_s30  ;;  %p507_p9 = scmp.lt.s32.totalorder %s501_s30, %s501_s30 }
  0x4e   :  { %p508_p10 = por %p507_p9, %p506_p8 }
  0x50   :  { %p509_p11 = pnand %p508_p10, %p502_p7 }
  0x52   :  { %512 = shalt.err (!%p509_p11)
}
  0x53   :  { %70 = dma.hbm_to_vmem [thread:$0]  %s688_s4, 256, %s65_s13, [#allocation10], %s546_s20, %s546_s20, %s547_s21  }
  0x54   :  { %535 = dma.done.wait [#allocation4], 128  }
  0x55   :  { %536 = vsyncadd [#allocation4], 4294967168 }
  0x56   :  { %537 = dma.done.wait [#allocation7], 384  }
  0x57   :  { %538 = vsyncadd [#allocation7], 4294966912 }
  0x58   :  { %539 = dma.done.wait [#allocation10], 512  }
  0x59   :  { %540 = vsyncadd [#allocation10], 4294966784  ;;  %v550_v0 = vmov 0.0   ;;  %vm551_vm0 = vmmov 0   ;;  %v391_v1 = vld [vmem:[#allocation8] sm:$0xff]   ;;  %v392_v2 = vld [vmem:[#allocation9] sm:$0xff]  }
  0x5a   :  { %355 = vmatprep.subr.bf16.mxu0 %v550_v0  ;;  %363 = vmatprep.subr.bf16.mxu1 %v550_v0  ;;  %v393_v3 = vld [vmem:[#allocation8 + $0x8] sm:$0xff]   ;;  %vm94_vm1 = vcmask 261120   ;;  %v394_v4 = vld [vmem:[#allocation9 + $0x8] sm:$0xff]   ;;  %v97_v6 = vld [vmem:[#allocation3] sm:$0xff]  ;;  %s553_s3 = smov 96   ;;  %s554_s8 = smov [#allocation12]  }
  0x5b   :  { %359 = vmatprep.mubr.msk.bf16.mxu0 %vm551_vm0, %v550_v0  ;;  %367 = vmatprep.mubr.msk.bf16.mxu1 %vm551_vm0, %v550_v0  ;;  %v93_v5 = vld [vmem:[#allocation6] sm:$0xff]  ;;  %v98_v7 = vpack.c.bf16 %v97_v6, %v97_v6  ;;  %v395_v10 = vld [vmem:[#allocation11] sm:$0xff]   ;;  %v396_v11 = vld [vmem:[#allocation11 + $0x8] sm:$0xff]  }
  0x5c   :  { %356 = vmatpush3.bf16.msra.mxu0 %v391_v1  ;;  %364 = vmatpush3.bf16.msra.mxu1 %v392_v2  ;;  %95 = vst.msk [vmem:[#allocation2] sm:$0xff] %vm94_vm1, %v93_v5  ;;  %v335_v12 = vld [vmem:[%s689_s5] ss:$0 sm:$0xff]  ;;  %s552_s5 = smov 32  }
  0x5d   :  { %357 = vmatprep.subr.bf16.mxu0 %v550_v0  ;;  %365 = vmatprep.subr.bf16.mxu1 %v550_v0 }
  0x60   :  { %358 = vmatpush3.bf16.msra.mxu0 %v393_v3  ;;  %366 = vmatpush3.bf16.msra.mxu1 %v394_v4 }
  0x61   :  { %371 = vmatprep.subr.bf16.mxu0 %v550_v0 }
  0x63   :  { %360 = vmatmul.mubr.msk.bf16.vlgmr.msra.gmra.mrb[0].mxu0 %vm94_vm1, %v98_v7  ;;  %v96_v8 = vld [vmem:[#allocation2] sm:$0xff] }
  0x64   :  { %375 = vmatprep.mubr.msk.bf16.mxu0 %vm551_vm0, %v550_v0  ;;  %v99_v9 = vpack.c.bf16 %v96_v8, %v96_v8  ;;  %372 = vmatpush3.bf16.msra.mxu0 %v395_v10 }
  0x65   :  { %373 = vmatprep.subr.bf16.mxu0 %v550_v0 }
  0x66   :  { %368 = vmatmul.mubr.msk.bf16.vlgmr.msra.gmra.mrb[0].mxu1 %vm94_vm1, %v99_v9 }
  0x68   :  { %374 = vmatpush3.bf16.msra.mxu0 %v396_v11 }
 0x136   :  { %v161_v13 = vpop.f32.mrb[0].mxu0 }
 0x137   :  { %v361_v14 = vpop.f32.mrb[1].mxu0  ;;  %v162_v16 = vadd.f32 %v335_v12, %v161_v13 }
 0x138   :  { %v164_v15 = vpop.f32.mrb[2].mxu0 }
 0x139   :  { %v362_v17 = vpop.f32.mrb[3].mxu0  ;;  %v220_v18 = vpop.f32.mrb[0].mxu1 }
 0x13a   :  { %v226_v19 = vadd.f32 %v220_v18, %v162_v16  ;;  %v369_v20 = vpop.f32.mrb[1].mxu1 }
 0x13b   :  { %v223_v21 = vpop.f32.mrb[2].mxu1 }
 0x13c   :  { %v342_v22 = vmul.f32 -1.442695, %v226_v19  ;;  %v370_v23 = vpop.f32.mrb[3].mxu1 }
 0x13e   :  { %397 = vpow2.f32 %v342_v22 }
 0x148   :  { %v398_v24 = vpop.eup %397 }
 0x149   :  { %v230_v25 = vadd.f32 1.0, %v398_v24 }
 0x14b   :  { %399 = vrcp.f32 %v230_v25 }
 0x155   :  { %v400_v26 = vpop.eup %399 }
 0x156   :  { %v233_v27 = vmul.f32 %v400_v26, %v96_v8  ;;  %v305_v37 = vsub.f32 1.0, %v400_v26 }
 0x158   :  { %v234_v28 = vpack.c.bf16 %v233_v27, %v233_v27 }
 0x15a   :  { %376 = vmatmul.mubr.msk.bf16.vlgmr.msra.gmra.mrb[4].mxu0 %vm94_vm1, %v234_v28 }
 0x22d   :  { %v288_v29 = vpop.f32.mrb[4].mxu0 }
 0x22e   :  { %295 = vrot.lane.b32.xlu0 %v288_v29, %s546_s20  ;;  %v377_v30 = vpop.f32.mrb[5].mxu0  ;;  %s324_s20 = sshll.u32 %s554_s8, 4  ;;  %s325_s20 = int_to_ptr.vmem [resolvable:$true] %s324_s20 }
 0x22f   :  { %v291_v31 = vpop.f32.mrb[6].mxu0  ;;  %s513_s9 = scalar_lea.vmem %s325_s20, 128  ;;  %p518_p13 = scmp.lt.s32.totalorder %s325_s20, %s325_s20 }
 0x230   :  { %v378_v32 = vpop.f32.mrb[7].mxu0  ;;  %p514_p12 = scmp.ne.s32.totalorder %s325_s20, %s513_s9  ;;  %p519_p0 = scmp.lt.s32.totalorder %s513_s9, %s513_s9 }
 0x232   :  { %301 = vrot.lane.b32.xlu0 %v96_v8, %s552_s5  ;;  %p520_p1 = por %p519_p0, %p518_p13 }
 0x234   :  { %p521_p2 = pnand %p520_p1, %p514_p12 }
 0x2a0   :  { %v296_v33 = vpop.permute.xlu0 %295 }
 0x2a1   :  { %v298_v34 = vadd.f32 %v296_v33, %v162_v16 }
 0x2a3   :  { %401 = vtanh.f32 %v298_v34 }
 0x2a4   :  { %v302_v36 = vpop.permute.xlu0 %301 }
 0x2a5   :  { %v304_v39 = vmul.f32 %v400_v26, %v302_v36 }
 0x2ad   :  { %v402_v35 = vpop.eup %401 }
 0x2ae   :  { %307 = vrot.lane.b32.xlu1 %v402_v35, %s553_s3 }
 0x320   :  { %v308_v38 = vpop.permute.xlu1 %307 }
 0x321   :  { %v310_v40 = vmul.f32 %v308_v38, %v305_v37 }
 0x323   :  { %v311_v41 = vadd.f32 %v310_v40, %v304_v39 }
 0x325   :  { %313 = vrot.lane.b32.xlu1 %v311_v41, %s553_s3 }
 0x397   :  { %v314_v42 = vpop.permute.xlu1 %313 }
 0x398   :  { %316 = vst.msk [vmem:[#allocation2] sm:$0xff] %vm94_vm1, %v314_v42  ;;  %317 = vst.msk [vmem:[#allocation12] sm:$0xff] %vm94_vm1, %v314_v42 }
 0x399   :  { %524 = shalt.err (!%p521_p2)
}
 0x39a   :  { %s525_s13 = scalar_lea.hbm %s690_s6, 128 }
 0x39b   :  { %p526_p3 = scmp.ne.s32.totalorder %s690_s6, %s525_s13  ;;  %p529_p4 = scmp.lt.u32.totalorder %s525_s13, %s690_s6 }
 0x39d   :  { %p531_p5 = pnand %p529_p4, %p526_p3 }
 0x39f   :  { %534 = shalt.err (!%p531_p5)
}
 0x3a0   :  { %327 = dma.vmem_to_hbm [thread:$0]  %s325_s20, 128, %s690_s6, [#allocation5]  }
 0x3a1   :  { %541 = dma.done.wait [#allocation5], 128  }
 0x3a2   :  { %542 = vsyncadd [#allocation5], 4294967168 }
 0x3a3   :  { %331 = vsyncpa [#allocation4], 1 }
 0x3a4   :  { %332 = vsyncpa [#allocation7], 1 }
 0x3a5   :  { %333 = vsyncpa [#allocation10], 1 }
 0x3a6   :  { %334 = vsyncpa [#allocation5], 1 }

</bundles_post_ra>
